<compile_context>
chip_gen: v5e
topology: v5e:2x2
jax: 0.10.0
libtpu: 0.0.40
codegen_flags: <defaults>
</compile_context>

<pallas_src>
import functools

import jax
import jax.numpy as jnp
from jax.experimental import pallas as pl
from jax.experimental.pallas import tpu as pltpu

_MIB = 1024 * 1024
_SQRT_HALF = 0.7071067811865476
_SQRT_2_OVER_PI = 0.7978845608028654


def _gelu_f32(h, approximate):
    """GELU on an f32 tile.  approximate=False matches torch.nn.GELU()."""
    if approximate:
        # tanh variant: the transcendental runs on the otherwise-idle EUP slot.
        inner = _SQRT_2_OVER_PI * (h + 0.044715 * (h * h * h))
        return 0.5 * h * (1.0 + jnp.tanh(inner))
    return 0.5 * h * (1.0 + jax.lax.erf(h * _SQRT_HALF))
    # TODO(synk): on v6e/v7x the bias-add + GELU could run in bf16 (bf16 VALU)
    # to halve VALU work once MXU-bound; kept in f32 here for portable lowering.


# -----------------------------------------------------------------------------
# Kernels
# -----------------------------------------------------------------------------
def _ff_kernel_resident(x_ref, w1_ref, b1_ref, w2_ref, b2_ref, o_ref, *,
                        approximate):
    """Weights fully resident in VMEM: one fused pass per row tile."""
    h = jnp.dot(x_ref[...], w1_ref[...], preferred_element_type=jnp.float32)
    h = _gelu_f32(h + b1_ref[...], approximate)
    # Dropout(p=0.0) -> identity.
    o = jnp.dot(h.astype(w2_ref.dtype), w2_ref[...],
                preferred_element_type=jnp.float32)
    o_ref[...] = (o + b2_ref[...]).astype(o_ref.dtype)


def _ff_kernel_streamed(x_ref, w1_ref, b1_ref, w2_ref, b2_ref, o_ref, acc_ref,
                        *, approximate):
    """Hidden-chunk streaming: grid = (row tiles, hidden chunks)."""
    k = pl.program_id(1)

    @pl.when(k == 0)
    def _():
        # Fold the output bias into the accumulator init (saves a separate
        # (tm, dim) add + store pass in the epilogue).
        acc_ref[...] = jnp.broadcast_to(b2_ref[...], acc_ref.shape)

    h = jnp.dot(x_ref[...], w1_ref[...], preferred_element_type=jnp.float32)
    h = _gelu_f32(h + b1_ref[...], approximate)
    # Dropout(p=0.0) -> identity.
    acc_ref[...] += jnp.dot(h.astype(w2_ref.dtype), w2_ref[...],
                            preferred_element_type=jnp.float32)

    @pl.when(k == pl.num_programs(1) - 1)
    def _():
        o_ref[...] = acc_ref[...].astype(o_ref.dtype)


# -----------------------------------------------------------------------------
# Host-side helpers
# -----------------------------------------------------------------------------
def _round_up(x, n):
    return (x + n - 1) // n * n


def _pad2d(a, rows, cols, dtype):
    a = a.astype(dtype)
    if a.shape == (rows, cols):
        return a
    return jnp.zeros((rows, cols), dtype).at[: a.shape[0], : a.shape[1]].set(a)


def _vmem_budget_bytes():
    """Per-generation scoped-VMEM budget with headroom for Mosaic scratch."""
    try:
        phys = int(pltpu.get_tpu_info().vmem_capacity_bytes)
    except Exception:  # conservative fallback = v7x-sized VMEM
        phys = 64 * _MIB
    # 128 MiB parts (v5e/v6e): ~100 MiB; 64 MiB parts (v7x): ~48 MiB.
    return max(32 * _MIB, min(phys - 16 * _MIB, 100 * _MIB))


def _pick_tile(m, candidates):
    """Largest candidate giving >=2 row tiles (megacore), else a 16-aligned m."""
    for cand in candidates:
        if m >= 2 * cand:
            return cand
    return _round_up(max(m, 1), 16)


def _resident_vmem_bytes(tm, dim_p, hidden_p, esz, osz):
    return (2 * 2 * dim_p * hidden_p * esz   # w1 + w2 (2 buffers each, DMA'd once)
            + 2 * (hidden_p + dim_p) * 4     # biases (f32)
            + 2 * tm * dim_p * esz           # x row tile (double-buffered)
            + 2 * tm * dim_p * osz           # output row tile (double-buffered)
            + tm * hidden_p * 4              # f32 h intermediate
            + tm * hidden_p * esz)           # compute-dtype h for 2nd matmul


def _streamed_vmem_bytes(tm, dim_p, th, esz, osz):
    return (2 * tm * dim_p * esz             # x row tile
            + 2 * dim_p * th * esz           # w1 hidden chunk
            + 2 * th * dim_p * esz           # w2 hidden chunk
            + 2 * (th + dim_p) * 4           # bias chunks
            + 2 * tm * dim_p * osz           # output row tile
            + tm * dim_p * 4                 # f32 accumulator scratch
            + tm * th * (4 + esz))           # h intermediate (f32 + cast copy)


@functools.partial(jax.jit,
                   static_argnames=("block_m", "block_h", "compute_dtype",
                                    "approximate_gelu"))
def feedforward(x, w1, b1, w2, b2, *, block_m=None, block_h=None,
                compute_dtype=jnp.bfloat16, approximate_gelu=False):
    """x: (batch, seq, dim) -> (batch, seq, dim).  Weights transposed vs torch."""
    batch, seq, dim = x.shape
    hidden = w1.shape[1]
    out_dtype = x.dtype
    cd = jnp.dtype(compute_dtype)
    esz = cd.itemsize
    osz = jnp.dtype(out_dtype).itemsize

    m = batch * seq
    dim_p = _round_up(dim, 128)
    cap = _vmem_budget_bytes()

    # Validate user tile overrides (bf16 packs 16 rows per vreg).
    row_align = 16 if esz < 4 else 8
    if block_m is not None and (block_m <= 0 or block_m % row_align):
        raise ValueError(f"block_m must be a positive multiple of {row_align}")
    if block_h is not None and (block_h <= 0 or block_h % 128):
        raise ValueError("block_h must be a positive multiple of 128")

    # ---- Path selection: hold full weights resident whenever they fit. ------
    hidden_res = _round_up(hidden, 128)
    tm_res = block_m if block_m is not None else _pick_tile(
        m, (512, 256, 128, 64, 32, 16))
    use_resident = (block_h is None and
                    _resident_vmem_bytes(tm_res, dim_p, hidden_res, esz, osz)
                    * 1.15 <= cap)

    if use_resident:
        tm = tm_res
        hidden_p = hidden_res
        th = hidden_p
    else:
        # Streamed fallback: hidden chunks >=256 (256-wide MXU, never th=128)
        # and big row tiles so the k-loop stays MXU-bound (intensity ~ tm).
        if block_h is not None:
            th = block_h
            hidden_p = _round_up(hidden, th)
        else:
            hidden_p = _round_up(hidden, 256)
            th = 512 if hidden_p % 512 == 0 else 256
        if block_m is not None:
            tm = block_m
        else:
            tm = _pick_tile(m, (1024, 512, 256, 128, 64, 32, 16))
            while (tm > 256 and
                   _streamed_vmem_bytes(tm, dim_p, th, esz, osz) * 1.25 > cap):
                tm //= 2

    m_p = _round_up(m, tm)

    # Zero padding is exact: padded hidden columns give gelu(0)=0 against zero
    # w2 rows; padded dim columns / rows are sliced away at the end.
    x_p = _pad2d(x.reshape(m, dim), m_p, dim_p, cd)
    w1_p = _pad2d(w1, dim_p, hidden_p, cd)
    w2_p = _pad2d(w2, hidden_p, dim_p, cd)
    b1_p = _pad2d(b1.reshape(1, hidden), 1, hidden_p, jnp.float32)
    b2_p = _pad2d(b2.reshape(1, dim), 1, dim_p, jnp.float32)

    if use_resident:
        est = _resident_vmem_bytes(tm, dim_p, hidden_p, esz, osz)
        vmem_limit = int(min(max(est * 1.15, 32 * _MIB), cap))
        kernel = functools.partial(_ff_kernel_resident,
                                   approximate=approximate_gelu)
        out = pl.pallas_call(
            kernel,
            out_shape=jax.ShapeDtypeStruct((m_p, dim_p), out_dtype),
            grid_spec=pltpu.PrefetchScalarGridSpec(
                num_scalar_prefetch=0,
                grid=(m_p // tm,),
                in_specs=[
                    pl.BlockSpec((tm, dim_p), lambda i: (i, 0)),        # x tile
                    pl.BlockSpec((dim_p, hidden_p), lambda i: (0, 0)),  # w1 resident
                    pl.BlockSpec((1, hidden_p), lambda i: (0, 0)),      # b1
                    pl.BlockSpec((hidden_p, dim_p), lambda i: (0, 0)),  # w2 resident
                    pl.BlockSpec((1, dim_p), lambda i: (0, 0)),         # b2
                ],
                out_specs=pl.BlockSpec((tm, dim_p), lambda i: (i, 0)),
            ),
            compiler_params=pltpu.CompilerParams(
                dimension_semantics=("parallel",),
                vmem_limit_bytes=vmem_limit),
        )(x_p, w1_p, b1_p, w2_p, b2_p)
    else:
        est = _streamed_vmem_bytes(tm, dim_p, th, esz, osz)
        vmem_limit = int(min(max(est * 1.25, 32 * _MIB), cap))
        kernel = functools.partial(_ff_kernel_streamed,
                                   approximate=approximate_gelu)
        out = pl.pallas_call(
            kernel,
            out_shape=jax.ShapeDtypeStruct((m_p, dim_p), out_dtype),
            grid_spec=pltpu.PrefetchScalarGridSpec(
                num_scalar_prefetch=0,
                grid=(m_p // tm, hidden_p // th),
                in_specs=[
                    pl.BlockSpec((tm, dim_p), lambda i, k: (i, 0)),   # x tile
                    pl.BlockSpec((dim_p, th), lambda i, k: (0, k)),   # w1 chunk
                    pl.BlockSpec((1, th), lambda i, k: (0, k)),       # b1 chunk
                    pl.BlockSpec((th, dim_p), lambda i, k: (k, 0)),   # w2 chunk
                    pl.BlockSpec((1, dim_p), lambda i, k: (0, 0)),    # b2
                ],
                out_specs=pl.BlockSpec((tm, dim_p), lambda i, k: (i, 0)),
                scratch_shapes=[pltpu.VMEM((tm, dim_p), jnp.float32)],
            ),
            compiler_params=pltpu.CompilerParams(
                dimension_semantics=("parallel", "arbitrary"),
                vmem_limit_bytes=vmem_limit),
        )(x_p, w1_p, b1_p, w2_p, b2_p)

    return out[:m, :dim].reshape(batch, seq, dim)


def init_params(key, dim, hidden_dim, dtype=jnp.float32):
    """Deterministic init mimicking nn.Linear's uniform(-1/sqrt(fan_in), ...)."""
    k1, k2, k3, k4 = jax.random.split(key, 4)
    lim1 = 1.0 / (dim ** 0.5)
    lim2 = 1.0 / (hidden_dim ** 0.5)
    # Stored transposed vs. PyTorch: w1 is (dim, hidden), w2 is (hidden, dim).
    w1 = jax.random.uniform(k1, (dim, hidden_dim), dtype, -lim1, lim1)
    b1 = jax.random.uniform(k2, (hidden_dim,), dtype, -lim1, lim1)
    w2 = jax.random.uniform(k3, (hidden_dim, dim), dtype, -lim2, lim2)
    b2 = jax.random.uniform(k4, (dim,), dtype, -lim2, lim2)
    return w1, b1, w2, b2


def _reference(x, w1, b1, w2, b2):
    h = jnp.einsum("bsd,dh->bsh", x, w1) + b1
    h = jax.nn.gelu(h, approximate=False)
    return jnp.einsum("bsh,hd->bsd", h, w2) + b2


# TODO(synk): nn.Dropout with p>0 (training mode) is not implemented; p=0.0 /
# eval mode is the identity, which is what the kernel computes.

if __name__ == "__main__":
    key = jax.random.PRNGKey(0)
    kx, kp, kx2, kp2, kx3, kp3 = jax.random.split(key, 6)

    # 1) Small config (dim/hidden below 128 exercise the lane-padding path;
    #    weights trivially resident in VMEM).
    batch, seq, dim, hidden_dim = 2, 8, 32, 64
    x = jax.random.normal(kx, (batch, seq, dim), dtype=jnp.float32)
    w1, b1, w2, b2 = init_params(kp, dim, hidden_dim)
    y = jax.block_until_ready(feedforward(x, w1, b1, w2, b2))
    y_ref = _reference(x, w1, b1, w2, b2)
    assert y.shape == (batch, seq, dim)
    # bf16 MXU inputs with f32 accumulation -> relaxed tolerance vs f32 reference.
    assert jnp.allclose(y, y_ref, atol=3e-2, rtol=3e-2), "mismatch (small)"

    # 1b) Optional tanh (approximate) GELU path.
    y_tanh = jax.block_until_ready(
        feedforward(x, w1, b1, w2, b2, approximate_gelu=True))
    assert jnp.allclose(y_tanh, y_ref, atol=3e-2, rtol=3e-2), "mismatch (tanh)"

    # 2) Non-aligned shapes: row padding + multi-row-tile resident path.
    batch2, seq2, dim2, hidden2 = 2, 72, 200, 300
    x2 = jax.random.normal(kx2, (batch2, seq2, dim2), dtype=jnp.float32)
    p2 = init_params(kp2, dim2, hidden2)
    y2 = jax.block_until_ready(feedforward(x2, *p2))
    y2_ref = _reference(x2, *p2)
    assert y2.shape == (batch2, seq2, dim2)
    assert jnp.allclose(y2, y2_ref, atol=3e-2, rtol=3e-2), "mismatch (padded)"

    # 3) Force the streamed (hidden-chunked) path via block_h to exercise the
    #    2-D grid, the f32 accumulator, and the folded-bias epilogue.
    batch3, seq3, dim3, hidden3 = 2, 64, 256, 512
    x3 = jax.random.normal(kx3, (batch3, seq3, dim3), dtype=jnp.float32)
    p3 = init_params(kp3, dim3, hidden3)
    y3 = jax.block_until_ready(feedforward(x3, *p3, block_h=256))
    y3_ref = _reference(x3, *p3)
    assert y3.shape == (batch3, seq3, dim3)
    assert jnp.allclose(y3, y3_ref, atol=3e-2, rtol=3e-2), "mismatch (streamed)"

    print("KERNEL_OK")
</pallas_src>

<mosaic_0001>
module attributes {stable_mosaic.version = 11 : i64} {
  func.func @_ff_kernel_resident(%arg0: i32, %arg1: memref<16x128xbf16, #tpu.memory_space<vmem>>, %arg2: memref<128x128xbf16, #tpu.memory_space<vmem>>, %arg3: memref<1x128xf32, #tpu.memory_space<vmem>>, %arg4: memref<128x128xbf16, #tpu.memory_space<vmem>>, %arg5: memref<1x128xf32, #tpu.memory_space<vmem>>, %arg6: memref<16x128xf32, #tpu.memory_space<vmem>>) attributes {dimension_semantics = [#tpu.dimension_semantics<parallel>], iteration_bounds = array<i64: 1>, scalar_prefetch = 0 : i64, scratch_operands = 0 : i64, tpu.core_type = #tpu.core_type<tc>, window_params = [{transform_indices = @transform_0, window_bounds = array<i64: 16, 128>}, {pipeline_mode = #tpu.pipeline_mode<synchronous>, transform_indices = @transform_1, window_bounds = array<i64: 128, 128>}, {pipeline_mode = #tpu.pipeline_mode<synchronous>, transform_indices = @transform_2, window_bounds = array<i64: 1, 128>}, {pipeline_mode = #tpu.pipeline_mode<synchronous>, transform_indices = @transform_3, window_bounds = array<i64: 128, 128>}, {pipeline_mode = #tpu.pipeline_mode<synchronous>, transform_indices = @transform_4, window_bounds = array<i64: 1, 128>}, {transform_indices = @transform_5, window_bounds = array<i64: 16, 128>}]} {
    %c0 = arith.constant 0 : index
    %c0_0 = arith.constant 0 : index
    %0 = vector.load %arg1[%c0, %c0_0] : memref<16x128xbf16, #tpu.memory_space<vmem>>, vector<16x128xbf16>
    %c0_1 = arith.constant 0 : index
    %c0_2 = arith.constant 0 : index
    %1 = vector.load %arg2[%c0_1, %c0_2] : memref<128x128xbf16, #tpu.memory_space<vmem>>, vector<128x128xbf16>
    %cst = arith.constant dense<0.000000e+00> : vector<16x128xf32>
    %2 = tpu.matmul %0, %1, %cst {dimension_numbers = #tpu.dot_dimension_numbers<[1], [0], [0], [1], [0, 0, 1, 1], [], []>} : vector<16x128xbf16>, vector<128x128xbf16>, vector<16x128xf32> -> vector<16x128xf32>
    %c0_3 = arith.constant 0 : index
    %c0_4 = arith.constant 0 : index
    %3 = vector.load %arg3[%c0_3, %c0_4] : memref<1x128xf32, #tpu.memory_space<vmem>>, vector<1x128xf32>
    %4 = vector.broadcast %3 : vector<1x128xf32> to vector<16x128xf32>
    %5 = arith.addf %2, %4 : vector<16x128xf32>
    %cst_5 = arith.constant 5.000000e-01 : f32
    %6 = vector.broadcast %cst_5 : f32 to vector<16x128xf32>
    %7 = arith.mulf %6, %5 : vector<16x128xf32>
    %cst_6 = arith.constant 0.707106769 : f32
    %8 = vector.broadcast %cst_6 : f32 to vector<16x128xf32>
    %9 = arith.mulf %5, %8 : vector<16x128xf32>
    %10 = math.erf %9 : vector<16x128xf32>
    %cst_7 = arith.constant 1.000000e+00 : f32
    %11 = vector.broadcast %cst_7 : f32 to vector<16x128xf32>
    %12 = arith.addf %11, %10 : vector<16x128xf32>
    %13 = arith.mulf %7, %12 : vector<16x128xf32>
    %14 = arith.truncf %13 : vector<16x128xf32> to vector<16x128xbf16>
    %c0_8 = arith.constant 0 : index
    %c0_9 = arith.constant 0 : index
    %15 = vector.load %arg4[%c0_8, %c0_9] : memref<128x128xbf16, #tpu.memory_space<vmem>>, vector<128x128xbf16>
    %cst_10 = arith.constant dense<0.000000e+00> : vector<16x128xf32>
    %16 = tpu.matmul %14, %15, %cst_10 {dimension_numbers = #tpu.dot_dimension_numbers<[1], [0], [0], [1], [0, 0, 1, 1], [], []>} : vector<16x128xbf16>, vector<128x128xbf16>, vector<16x128xf32> -> vector<16x128xf32>
    %c0_11 = arith.constant 0 : index
    %c0_12 = arith.constant 0 : index
    %17 = vector.load %arg5[%c0_11, %c0_12] : memref<1x128xf32, #tpu.memory_space<vmem>>, vector<1x128xf32>
    %18 = vector.broadcast %17 : vector<1x128xf32> to vector<16x128xf32>
    %19 = arith.addf %16, %18 : vector<16x128xf32>
    %c0_13 = arith.constant 0 : index
    %c0_14 = arith.constant 0 : index
    %20 = vector.load %arg6[%c0_13, %c0_14] : memref<16x128xf32, #tpu.memory_space<vmem>>, vector<16x128xf32>
    tpu.vector_store %arg6[%c0_13, %c0_14], %19 {strides = array<i32>} : memref<16x128xf32, #tpu.memory_space<vmem>>, vector<16x128xf32>,
    return
  }
  func.func @transform_0(%arg0: i32) -> (i32, i32) {
    %c0_i32 = arith.constant 0 : i32
    %c0_i32_0 = arith.constant 0 : i32
    return %arg0, %c0_i32 : i32, i32
  }
  func.func @transform_1(%arg0: i32) -> (i32, i32) {
    %c0_i32 = arith.constant 0 : i32
    %c0_i32_0 = arith.constant 0 : i32
    %c0_i32_1 = arith.constant 0 : i32
    return %c0_i32, %c0_i32_0 : i32, i32
  }
  func.func @transform_2(%arg0: i32) -> (i32, i32) {
    %c0_i32 = arith.constant 0 : i32
    %c0_i32_0 = arith.constant 0 : i32
    %c0_i32_1 = arith.constant 0 : i32
    return %c0_i32, %c0_i32_0 : i32, i32
  }
  func.func @transform_3(%arg0: i32) -> (i32, i32) {
    %c0_i32 = arith.constant 0 : i32
    %c0_i32_0 = arith.constant 0 : i32
    %c0_i32_1 = arith.constant 0 : i32
    return %c0_i32, %c0_i32_0 : i32, i32
  }
  func.func @transform_4(%arg0: i32) -> (i32, i32) {
    %c0_i32 = arith.constant 0 : i32
    %c0_i32_0 = arith.constant 0 : i32
    %c0_i32_1 = arith.constant 0 : i32
    return %c0_i32, %c0_i32_0 : i32, i32
  }
  func.func @transform_5(%arg0: i32) -> (i32, i32) {
    %c0_i32 = arith.constant 0 : i32
    %c0_i32_0 = arith.constant 0 : i32
    return %arg0, %c0_i32 : i32, i32
  }
}

</mosaic_0001>

<bundles_post_ra>
// kernel: feedforward.1
= control target key start
LH: loop header
LB: loop body
LE: loop exit
PB: predicated region body
PF: predicated region fallthrough
CT: control target
= control target key end

     0   :  { %s491_s1 = inlined_call_operand.vmem [shape: bf16[128,128], index: 1, kind: input, shape index: {}]   ;;  %s492_s2 = inlined_call_operand.vmem [shape: f32[1,128], index: 2, kind: input, shape index: {}]   ;;  %s493_s0 = inlined_call_operand.vmem [shape: bf16[16,128], index: 0, kind: input, shape index: {}]   ;;  %s494_s4 = inlined_call_operand.vmem [shape: f32[1,128], index: 4, kind: input, shape index: {}]   ;;  %s495_s3 = inlined_call_operand.vmem [shape: bf16[128,128], index: 3, kind: input, shape index: {}]   ;;  %s496_s5 = inlined_call_operand.vmem [shape: f32[16,128], index: 5, kind: output, shape index: {}]  }
   0x1   :  { %v365_v0 = vld [vmem:[%s491_s1 + $0x38] sm:$0xff]  ;;  %v364_v1 = vld [vmem:[%s491_s1 + $0x30] sm:$0xff]  ;;  %v363_v2 = vld [vmem:[%s491_s1 + $0x28] sm:$0xff] }
   0x2   :  { %96 = vmatpush.bf16.msra.mxu0 %v365_v0  ;;  %v362_v3 = vld [vmem:[%s491_s1 + $0x20] sm:$0xff]  ;;  %v361_v4 = vld [vmem:[%s491_s1 + $0x18] sm:$0xff]  ;;  %v360_v5 = vld [vmem:[%s491_s1 + $0x10] sm:$0xff] }
   0x3   :  { %v359_v6 = vld [vmem:[%s491_s1 + $0x8] sm:$0xff]  ;;  %v358_v7 = vld [vmem:[%s491_s1] sm:$0xff]  ;;  %v373_v10 = vld [vmem:[%s495_s3 + $0x38] sm:$0xff] }
   0x4   :  { %v357_v8 = vld [vmem:[%s493_s0] sm:$0xff]  ;;  %267 = vmatpush.bf16.msra.mxu1 %v373_v10  ;;  %v372_v14 = vld [vmem:[%s495_s3 + $0x30] sm:$0xff]  ;;  %v371_v16 = vld [vmem:[%s495_s3 + $0x28] sm:$0xff] }
   0x5   :  { %v374_v9 = vld [vmem:[%s492_s2] ss:$0 sm:$0xff]  ;;  %v369_v27 = vld [vmem:[%s495_s3 + $0x18] sm:$0xff]  ;;  %v368_v33 = vld [vmem:[%s495_s3 + $0x10] sm:$0xff] }
   0x6   :  { %97 = vmatpush.bf16.msra.mxu0 %v364_v1  ;;  %v370_v21 = vld [vmem:[%s495_s3 + $0x20] sm:$0xff]  ;;  %v367_v41 = vld [vmem:[%s495_s3 + $0x8] sm:$0xff] }
   0x7   :  { %v366_v48 = vld [vmem:[%s495_s3] sm:$0xff] }
   0x8   :  { %268 = vmatpush.bf16.msra.mxu1 %v372_v14 }
   0xa   :  { %98 = vmatpush.bf16.msra.mxu0 %v363_v2 }
   0xc   :  { %269 = vmatpush.bf16.msra.mxu1 %v371_v16 }
   0xe   :  { %99 = vmatpush.bf16.msra.mxu0 %v362_v3 }
  0x10   :  { %270 = vmatpush.bf16.msra.mxu1 %v370_v21 }
  0x12   :  { %100 = vmatpush.bf16.msra.mxu0 %v361_v4 }
  0x14   :  { %271 = vmatpush.bf16.msra.mxu1 %v369_v27 }
  0x16   :  { %101 = vmatpush.bf16.msra.mxu0 %v360_v5 }
  0x18   :  { %272 = vmatpush.bf16.msra.mxu1 %v368_v33 }
  0x1a   :  { %102 = vmatpush.bf16.msra.mxu0 %v359_v6 }
  0x1c   :  { %273 = vmatpush.bf16.msra.mxu1 %v367_v41 }
  0x1e   :  { %103 = vmatpush.bf16.msra.mxu0 %v358_v7 }
  0x20   :  { %274 = vmatpush.bf16.msra.mxu1 %v366_v48 }
  0x21   :  { %104 = vmatmul.bf16.vlgmr.msra.gmra.mxu0 %v357_v8 }
  0x9e   :  { %v105_v11 = vpop.f32.mrf.mxu0 }
  0x9f   :  { %v443_v12 = vadd.f32 %v374_v9, %v105_v11 }
  0xa1   :  { %v446_v13 = vmul.f32 0.70710677, %v443_v12 }
  0xa3   :  { %v114_v15 = vmul.f32 %v446_v13, %v446_v13 }
  0xa5   :  { %v115_v17 = vmin.f32 %v114_v15, 16.0 }
  0xa6   :  { %v107_v18 = vpop.f32.mrf.mxu0 }
  0xa7   :  { %v116_v19 = vmul.f32 2.1237322e-06, %v115_v17  ;;  %v456_v20 = vadd.f32 %v374_v9, %v107_v18  ;;  %v127_v22 = vmul.f32 3.8918573e-05, %v115_v17 }
  0xa9   :  { %v117_v23 = vadd.f32 0.00028619796, %v116_v19  ;;  %v462_v24 = vmul.f32 0.70710677, %v456_v20  ;;  %v128_v25 = vadd.f32 0.001143296, %v127_v22 }
  0xab   :  { %v154_v26 = vmul.f32 %v462_v24, %v462_v24  ;;  %v118_v28 = vmul.f32 %v117_v23, %v115_v17  ;;  %v129_v29 = vmul.f32 %v128_v25, %v115_v17 }
  0xad   :  { %v155_v30 = vmin.f32 %v154_v26, 16.0  ;;  %v130_v31 = vadd.f32 0.014752088, %v129_v29  ;;  %v119_v35 = vadd.f32 0.0036580483, %v118_v28 }
  0xaf   :  { %v156_v32 = vmul.f32 2.1237322e-06, %v155_v30  ;;  %v167_v34 = vmul.f32 3.8918573e-05, %v155_v30  ;;  %v131_v36 = vmul.f32 %v130_v31, %v115_v17  ;;  %v120_v43 = vmul.f32 %v119_v35, %v115_v17 }
  0xb0   :  { %v111_v35 = vmul.f32 0.5, %v456_v20 }
  0xb1   :  { %v157_v37 = vadd.f32 0.00028619796, %v156_v32  ;;  %v168_v38 = vadd.f32 0.001143296, %v167_v34  ;;  %v132_v39 = vadd.f32 0.112945676, %v131_v36 }
  0xb2   :  { %v121_v50 = vadd.f32 0.05243302, %v120_v43  ;;  %v110_v34 = vmul.f32 0.5, %v443_v12 }
  0xb3   :  { %v158_v40 = vmul.f32 %v157_v37, %v155_v30  ;;  %v169_v42 = vmul.f32 %v168_v38, %v155_v30  ;;  %v133_v44 = vmul.f32 %v132_v39, %v115_v17 }
  0xb4   :  { %v122_v56 = vmul.f32 %v121_v50, %v115_v17 }
  0xb5   :  { %v159_v45 = vadd.f32 0.0036580483, %v158_v40  ;;  %v170_v46 = vadd.f32 0.014752088, %v169_v42  ;;  %v134_v47 = vadd.f32 0.4994258, %v133_v44 }
  0xb6   :  { %v123_v60 = vadd.f32 0.18741608, %v122_v56 }
  0xb7   :  { %v171_v49 = vmul.f32 %v170_v46, %v155_v30  ;;  %v135_v51 = vmul.f32 %v134_v47, %v115_v17  ;;  %v160_v52 = vmul.f32 %v159_v45, %v155_v30 }
  0xb8   :  { %v124_v1 = vmul.f32 %v123_v60, %v115_v17 }
  0xb9   :  { %v172_v53 = vadd.f32 0.112945676, %v171_v49  ;;  %v136_v54 = vadd.f32 1.0, %v135_v51  ;;  %v161_v57 = vadd.f32 0.05243302, %v160_v52 }
  0xba   :  { %v125_v7 = vadd.f32 1.1283791, %v124_v1 }
  0xbb   :  { %v173_v55 = vmul.f32 %v172_v53, %v155_v30  ;;  %376 = vrcp.f32 %v136_v54  ;;  %v162_v61 = vmul.f32 %v161_v57, %v155_v30  ;;  %v148_v4 = vand.u32 2147483648, %v136_v54 }
  0xbc   :  { %v146_v6 = vand.u32 2147483647, %v136_v54  ;;  %vm142_vm1 = vweird.f32 %v136_v54  ;;  %v126_v16 = vmul.f32 %v125_v7, %v446_v13 }
  0xbd   :  { %v174_v58 = vadd.f32 0.4994258, %v173_v55  ;;  %v163_v2 = vadd.f32 0.18741608, %v162_v61  ;;  %v149_v11 = vor.u32 1.1754944e-38, %v148_v4 }
  0xbe   :  { %vm147_vm3 = vcmp.eq.f32.partialorder %v146_v6, 8.507059e+37 }
  0xbf   :  { %v175_v59 = vmul.f32 %v174_v58, %v155_v30  ;;  %v164_v9 = vmul.f32 %v163_v2, %v155_v30 }
  0xc1   :  { %v176_v62 = vadd.f32 1.0, %v175_v59  ;;  %v377_v63 = vpop.eup %376  ;;  %v165_v19 = vadd.f32 1.1283791, %v164_v9 }
  0xc2   :  { %v138_v0 = vmul.f32 %v377_v63, %v136_v54  ;;  %vm143_vm0 = vweird.f32 %v377_v63 }
  0xc3   :  { %378 = vrcp.f32 %v176_v62  ;;  %vm144_vm2 = vmor %vm142_vm1, %vm143_vm0  ;;  %v188_v21 = vand.u32 2147483648, %v176_v62  ;;  %v186_v25 = vand.u32 2147483647, %v176_v62  ;;  %vm182_vm5 = vweird.f32 %v176_v62 }
  0xc4   :  { %v139_v3 = vsub.f32 1.0, %v138_v0  ;;  %v166_v28 = vmul.f32 %v165_v19, %v462_v24  ;;  %v375_v24 = vld [vmem:[%s494_s4] ss:$0 sm:$0xff] }
  0xc5   :  { %v189_v27 = vor.u32 1.1754944e-38, %v188_v21  ;;  %vm187_vm7 = vcmp.eq.f32.partialorder %v186_v25, 8.507059e+37 }
  0xc6   :  { %v140_v5 = vmul.f32 %v377_v63, %v139_v3 }
  0xc8   :  { %v141_v10 = vadd.f32 %v377_v63, %v140_v5 }
  0xc9   :  { %v379_v8 = vpop.eup %378 }
  0xca   :  { %v178_v14 = vmul.f32 %v379_v8, %v176_v62  ;;  %v145_v15 = vsel %vm144_vm2, %v377_v63, %v141_v10  ;;  %vm183_vm4 = vweird.f32 %v379_v8 }
  0xcb   :  { %v150_v18 = vsel %vm147_vm3, %v149_v11, %v145_v15  ;;  %vm184_vm6 = vmor %vm182_vm5, %vm183_vm4 }
  0xcc   :  { %v179_v17 = vsub.f32 1.0, %v178_v14  ;;  %v151_v22 = vmul.f32 %v150_v18, %v126_v16 }
  0xce   :  { %v180_v23 = vmul.f32 %v379_v8, %v179_v17  ;;  %v323_v29 = vclamps-f32 %v151_v22, 1.0 }
  0xd0   :  { %v181_v26 = vadd.f32 %v379_v8, %v180_v23  ;;  %v194_v33 = vadd.f32 1.0, %v323_v29 }
  0xd2   :  { %v185_v30 = vsel %vm184_vm6, %v379_v8, %v181_v26  ;;  %v196_v37 = vmul.f32 %v194_v33, %v110_v34 }
  0xd3   :  { %v190_v31 = vsel %vm187_vm7, %v189_v27, %v185_v30 }
  0xd4   :  { %v191_v32 = vmul.f32 %v190_v31, %v166_v28 }
  0xd6   :  { %v324_v13 = vclamps-f32 %v191_v32, 1.0 }
  0xd8   :  { %v195_v36 = vadd.f32 1.0, %v324_v13 }
  0xda   :  { %v197_v38 = vmul.f32 %v195_v36, %v111_v35 }
  0xdc   :  { %v198_v39 = vpack.c.bf16 %v197_v38, %v196_v37 }
  0xde   :  { %275 = vmatmul.bf16.vlgmr.msra.gmra.mxu1 %v198_v39 }
 0x15b   :  { %v276_v40 = vpop.f32.mrf.mxu1 }
 0x15c   :  { %v277_v41 = vadd.f32 %v375_v24, %v276_v40 }
 0x15e   :  { %281 = vst [vmem:[%s496_s5] sm:$0xff] %v277_v41 }
 0x163   :  { %v278_v42 = vpop.f32.mrf.mxu1 }
 0x164   :  { %v279_v43 = vadd.f32 %v375_v24, %v278_v42 }
 0x166   :  { %282 = vst [vmem:[%s496_s5 + $0x8] sm:$0xff] %v279_v43 }

</bundles_post_ra>
